<compile_context>
chip_gen: v5e
topology: v5e:2x2
jax: 0.10.0
libtpu: 0.0.40
codegen_flags: <defaults>
</compile_context>

<pallas_src>
import functools

import jax
import jax.numpy as jnp
from jax.experimental import pallas as pl
from jax.experimental.pallas import tpu as pltpu


def _round_up(n, m):
    return ((n + m - 1) // m) * m


# ----------------------------------------------------------------------------
# Pallas kernels: tiled matmul (+ fused bias), f32 accumulation on the MXU
# ----------------------------------------------------------------------------
def _mm_bias_kernel(x_ref, w_ref, b_ref, o_ref):
    # single expression: MXU matmul -> bias add -> cast -> lane-dense store
    o_ref[...] = (jnp.dot(x_ref[...], w_ref[...],
                          preferred_element_type=jnp.float32)
                  + b_ref[...].astype(jnp.float32)).astype(o_ref.dtype)


def _mm_kernel(x_ref, w_ref, o_ref):
    o_ref[...] = jnp.dot(x_ref[...], w_ref[...],
                         preferred_element_type=jnp.float32).astype(o_ref.dtype)


def _pick_tiles(M, K, Np, in_itemsize, out_itemsize, *, min_grid_m=8,
                max_row_tile=4096):
    """Generation-aware (v5e/v6e/v7x) tile sizes for the (M,K)x(K,Np) GEMM."""
    # lane tile (N): full Np when small, else largest of 512/256/128 dividing Np
    if Np <= 512:
        TN = Np
    else:
        TN = 128
        for cand in (512, 256):
            if Np % cand == 0:
                TN = cand
                break

    try:
        info = pltpu.get_tpu_info()
        vmem_cap = int(getattr(info, "vmem_capacity_bytes", 64 * 1024 * 1024))
    except Exception:
        vmem_cap = 64 * 1024 * 1024          # conservative (v7x per-TC VMEM)
    budget = min(vmem_cap // 3, 40 * 1024 * 1024)

    w_bytes = 2 * K * TN * in_itemsize                    # double-buffered weight tile
    per_row = 2 * (K * in_itemsize + TN * out_itemsize)   # double-buffered x + out rows
    tm_budget = max(8, (budget - w_bytes) // per_row)

    # keep >= min_grid_m grid steps: feeds both v7x TensorCores + pipelining
    tm_split = _round_up(max(pl.cdiv(M, min_grid_m), 1), 8)
    TM = int(min(tm_budget, tm_split, max_row_tile))
    TM = max(8, (TM // 8) * 8)
    TM = min(TM, _round_up(M, 8))

    need = 2 * (TM * K * in_itemsize + TM * TN * out_itemsize) + w_bytes
    vmem_limit = None
    if need > 12 * 1024 * 1024:               # only raise when default is tight
        vmem_limit = int(min(vmem_cap, need * 2 + (8 << 20)))
    return TM, TN, vmem_limit


def pallas_matmul_bias(x, w, b=None, *, out_dtype=None):
    """x: (M, K), w: (K, Np) with Np % 128 == 0, b: (Np,) or None -> (M, Np)."""
    M, K = x.shape
    Kw, Np = w.shape
    assert K == Kw, (K, Kw)
    assert Np % 128 == 0, "pad the output/channel dim to a multiple of 128 first"
    out_dtype = jnp.dtype(out_dtype) if out_dtype is not None else jnp.dtype(x.dtype)

    TM, TN, vmem_limit = _pick_tiles(M, K, Np,
                                     jnp.dtype(x.dtype).itemsize,
                                     out_dtype.itemsize)
    grid = (pl.cdiv(M, TM), Np // TN)

    x_spec = pl.BlockSpec((TM, K), lambda i, j: (i, 0))
    w_spec = pl.BlockSpec((K, TN), lambda i, j: (0, j))
    o_spec = pl.BlockSpec((TM, TN), lambda i, j: (i, j))
    out_shape = jax.ShapeDtypeStruct((M, Np), out_dtype)
    cparams = pltpu.CompilerParams(
        dimension_semantics=("parallel", "parallel"),
        vmem_limit_bytes=vmem_limit)

    if b is not None:
        b2 = b.reshape(1, Np)                       # kept in its own (f32) dtype
        return pl.pallas_call(
            _mm_bias_kernel,
            out_shape=out_shape,
            grid=grid,
            in_specs=[x_spec, w_spec, pl.BlockSpec((1, TN), lambda i, j: (0, j))],
            out_specs=o_spec,
            compiler_params=cparams,
        )(x, w, b2)

    # bias-free path: no synthesized zero bias, one fewer DMA per tile
    return pl.pallas_call(
        _mm_kernel,
        out_shape=out_shape,
        grid=grid,
        in_specs=[x_spec, w_spec],
        out_specs=o_spec,
        compiler_params=cparams,
    )(x, w)


# ----------------------------------------------------------------------------
# wrapper-side layout ops
# ----------------------------------------------------------------------------
def _patches_nonoverlap(x_nchw, p):
    """kernel_size == patch_size: one reshape/transpose straight from NCHW.
    No data duplication, no separate NCHW->NHWC pass."""
    B, C, H, W = x_nchw.shape
    Ho, Wo = H // p, W // p
    cols = x_nchw.reshape(B, C, Ho, p, Wo, p)
    cols = jnp.transpose(cols, (0, 2, 4, 3, 5, 1))        # (B, Ho, Wo, ki, kj, C)
    return cols.reshape(B * Ho * Wo, p * p * C), (B, Ho, Wo)


def _patches_general(x_nchw, ksize, stride, pad):
    """Overlapping kernel: reflect pad + k^2 strided gathers (tap order ki,kj,C).
    # TODO(synk): replace with an in-kernel halo DMA (memory_space=pl.ANY +
    # make_async_copy of row bands) to avoid the (k/stride)^2 HBM blow-up."""
    x = jnp.transpose(x_nchw, (0, 2, 3, 1))               # NCHW -> NHWC
    B, H, W, C = x.shape
    if pad > 0:
        x = jnp.pad(x, ((0, 0), (pad, pad), (pad, pad), (0, 0)), mode="reflect")
    Hp, Wp = H + 2 * pad, W + 2 * pad
    Ho = (Hp - ksize) // stride + 1
    Wo = (Wp - ksize) // stride + 1
    taps = []
    for di in range(ksize):
        for dj in range(ksize):
            taps.append(x[:, di:di + (Ho - 1) * stride + 1:stride,
                          dj:dj + (Wo - 1) * stride + 1:stride, :])
    cols = jnp.concatenate(taps, axis=-1)                 # (B, Ho, Wo, k*k*C)
    return cols.reshape(B * Ho * Wo, ksize * ksize * C), (B, Ho, Wo)


# ----------------------------------------------------------------------------
# PatchEmbed forward (PyTorch semantics: x -> Conv2d proj(x))
# ----------------------------------------------------------------------------
def patch_embed_forward(params, x_nchw, *, patch_size=4, kernel_size=None,
                        io_dtype=None, out_dtype=None, output_format="NCHW"):
    """params: {'w': (embed_dim, in_chans, k, k), 'b': (embed_dim,) or None}.

    output_format: "NCHW" (PyTorch default), "NHWC", or "tokens" (B, Ho*Wo, E)
    which skips the final transpose pass entirely.
    """
    w = params["w"]
    b = params.get("b", None)
    embed_dim, in_chans, kh, kw = w.shape
    if kernel_size is None:
        kernel_size = patch_size
    assert kh == kernel_size and kw == kernel_size
    pad = (kernel_size - patch_size + 1) // 2

    _, _, H, W = x_nchw.shape
    if (kernel_size == patch_size and pad == 0
            and H % patch_size == 0 and W % patch_size == 0):
        cols, (B, Ho, Wo) = _patches_nonoverlap(x_nchw, patch_size)
    else:
        cols, (B, Ho, Wo) = _patches_general(x_nchw, kernel_size, patch_size, pad)

    # (Cout, Cin, kh, kw) -> (kh*kw*Cin, Cout), matching tap order (ki, kj, C)
    w2 = jnp.transpose(w, (2, 3, 1, 0)).reshape(
        kernel_size * kernel_size * in_chans, embed_dim)

    # optional low-precision I/O (MXU still accumulates in f32)
    io_dt = jnp.dtype(io_dtype) if io_dtype is not None else jnp.dtype(cols.dtype)
    if io_dtype is not None:
        cols = cols.astype(io_dt)
        w2 = w2.astype(io_dt)
    if out_dtype is None:
        out_dtype = io_dt if io_dtype is not None else x_nchw.dtype

    # dtype-dependent sublane padding of K (8 f32 / 16 bf16 / 32 int8-fp8)
    sub = max(8, 32 // io_dt.itemsize)
    Kdim = cols.shape[1]
    Kp = _round_up(Kdim, sub)
    if Kp != Kdim:
        cols = jnp.pad(cols, ((0, 0), (0, Kp - Kdim)))
        w2 = jnp.pad(w2, ((0, Kp - Kdim), (0, 0)))

    # pad N (embed_dim) to a lane-dense multiple of 128 (unmasked vst)
    Np = _round_up(embed_dim, 128)
    if Np != embed_dim:
        w2 = jnp.pad(w2, ((0, 0), (0, Np - embed_dim)))
        if b is not None:
            b = jnp.pad(b, (0, Np - embed_dim))

    y = pallas_matmul_bias(cols, w2, b, out_dtype=out_dtype)     # (M, Np)

    if output_format == "tokens":
        return y.reshape(B, Ho * Wo, Np)[..., :embed_dim]        # no transpose pass
    y = y.reshape(B, Ho, Wo, Np)[..., :embed_dim]
    if output_format == "NHWC":
        return y
    return jnp.transpose(y, (0, 3, 1, 2))                        # NCHW (PyTorch)


# ----------------------------------------------------------------------------
# pure-JAX reference (for correctness check only)
# ----------------------------------------------------------------------------
def conv_ref(x_nchw, w, b, stride, pad):
    xp = x_nchw
    if pad > 0:
        xp = jnp.pad(xp, ((0, 0), (0, 0), (pad, pad), (pad, pad)), mode="reflect")
    y = jax.lax.conv_general_dilated(
        xp, w, (stride, stride), "VALID",
        dimension_numbers=("NCHW", "OIHW", "NCHW"))
    if b is not None:
        y = y + b.reshape(1, -1, 1, 1)
    return y


# ----------------------------------------------------------------------------
# main
# ----------------------------------------------------------------------------
if __name__ == "__main__":
    key = jax.random.PRNGKey(0)
    B, Cin, H, W = 2, 3, 16, 16
    embed_dim, patch_size = 96, 4

    k_x, k_w, k_b, k_w7 = jax.random.split(key, 4)
    x = jax.random.normal(k_x, (B, Cin, H, W), jnp.float32)

    # --- config A: defaults (kernel_size = patch_size = 4, pad = 0) ---------
    w4 = jax.random.normal(k_w, (embed_dim, Cin, 4, 4), jnp.float32) * 0.05
    b4 = jax.random.normal(k_b, (embed_dim,), jnp.float32) * 0.05
    params4 = {"w": w4, "b": b4}
    fwd4 = jax.jit(functools.partial(patch_embed_forward,
                                     patch_size=patch_size, kernel_size=None))
    out4 = jax.block_until_ready(fwd4(params4, x))
    assert out4.shape == (B, embed_dim, H // patch_size, W // patch_size), out4.shape
    assert bool(jnp.all(jnp.isfinite(out4)))
    ref4 = conv_ref(x, w4, b4, stride=patch_size, pad=0)
    assert bool(jnp.allclose(out4, ref4, rtol=2e-2, atol=2e-2)), \
        float(jnp.max(jnp.abs(out4 - ref4)))

    # --- config A': transpose-free token output ------------------------------
    fwd_tok = jax.jit(functools.partial(patch_embed_forward,
                                        patch_size=patch_size, kernel_size=None,
                                        output_format="tokens"))
    out_tok = jax.block_until_ready(fwd_tok(params4, x))
    ref_tok = jnp.transpose(ref4.reshape(B, embed_dim, -1), (0, 2, 1))
    assert out_tok.shape == ref_tok.shape
    assert bool(jnp.allclose(out_tok, ref_tok, rtol=2e-2, atol=2e-2))

    # --- config B: overlapping kernel (kernel_size=7 -> reflect pad=2) ------
    w7 = jax.random.normal(k_w7, (embed_dim, Cin, 7, 7), jnp.float32) * 0.05
    params7 = {"w": w7, "b": b4}
    fwd7 = jax.jit(functools.partial(patch_embed_forward,
                                     patch_size=patch_size, kernel_size=7))
    out7 = jax.block_until_ready(fwd7(params7, x))
    ref7 = conv_ref(x, w7, b4, stride=patch_size, pad=(7 - patch_size + 1) // 2)
    assert out7.shape == ref7.shape, (out7.shape, ref7.shape)
    assert bool(jnp.allclose(out7, ref7, rtol=2e-2, atol=2e-2)), \
        float(jnp.max(jnp.abs(out7 - ref7)))

    # --- config C: bf16 I/O and bf16 output (f32 MXU accumulation) ----------
    fwd_bf16 = jax.jit(functools.partial(patch_embed_forward,
                                         patch_size=patch_size, kernel_size=None,
                                         io_dtype=jnp.bfloat16))
    out_bf16 = jax.block_until_ready(fwd_bf16(params4, x))
    assert out_bf16.dtype == jnp.bfloat16
    assert bool(jnp.allclose(out_bf16.astype(jnp.float32), ref4,
                             rtol=5e-2, atol=5e-2)), \
        float(jnp.max(jnp.abs(out_bf16.astype(jnp.float32) - ref4)))

    print("KERNEL_OK")
</pallas_src>

<mosaic_0001>
module attributes {stable_mosaic.version = 11 : i64} {
  func.func @_mm_bias_kernel(%arg0: i32, %arg1: i32, %arg2: memref<8x48xf32, #tpu.memory_space<vmem>>, %arg3: memref<48x128xf32, #tpu.memory_space<vmem>>, %arg4: memref<1x128xf32, #tpu.memory_space<vmem>>, %arg5: memref<8x128xf32, #tpu.memory_space<vmem>>) attributes {dimension_semantics = [#tpu.dimension_semantics<parallel>, #tpu.dimension_semantics<parallel>], iteration_bounds = array<i64: 4, 1>, scalar_prefetch = 0 : i64, scratch_operands = 0 : i64, tpu.core_type = #tpu.core_type<tc>, window_params = [{transform_indices = @transform_0, window_bounds = array<i64: 8, 48>}, {transform_indices = @transform_1, window_bounds = array<i64: 48, 128>}, {transform_indices = @transform_2, window_bounds = array<i64: 1, 128>}, {transform_indices = @transform_3, window_bounds = array<i64: 8, 128>}]} {
    %c0 = arith.constant 0 : index
    %c0_0 = arith.constant 0 : index
    %0 = vector.load %arg2[%c0, %c0_0] : memref<8x48xf32, #tpu.memory_space<vmem>>, vector<8x48xf32>
    %c0_1 = arith.constant 0 : index
    %c0_2 = arith.constant 0 : index
    %1 = vector.load %arg3[%c0_1, %c0_2] : memref<48x128xf32, #tpu.memory_space<vmem>>, vector<48x128xf32>
    %cst = arith.constant dense<0.000000e+00> : vector<8x128xf32>
    %2 = tpu.matmul %0, %1, %cst {dimension_numbers = #tpu.dot_dimension_numbers<[1], [0], [0], [1], [0, 0, 1, 1], [], []>} : vector<8x48xf32>, vector<48x128xf32>, vector<8x128xf32> -> vector<8x128xf32>
    %c0_3 = arith.constant 0 : index
    %c0_4 = arith.constant 0 : index
    %3 = vector.load %arg4[%c0_3, %c0_4] : memref<1x128xf32, #tpu.memory_space<vmem>>, vector<1x128xf32>
    %4 = vector.broadcast %3 : vector<1x128xf32> to vector<8x128xf32>
    %5 = arith.addf %2, %4 : vector<8x128xf32>
    %c0_5 = arith.constant 0 : index
    %c0_6 = arith.constant 0 : index
    %6 = vector.load %arg5[%c0_5, %c0_6] : memref<8x128xf32, #tpu.memory_space<vmem>>, vector<8x128xf32>
    tpu.vector_store %arg5[%c0_5, %c0_6], %5 {strides = array<i32>} : memref<8x128xf32, #tpu.memory_space<vmem>>, vector<8x128xf32>,
    return
  }
  func.func @transform_0(%arg0: i32, %arg1: i32) -> (i32, i32) {
    %c0_i32 = arith.constant 0 : i32
    %c0_i32_0 = arith.constant 0 : i32
    return %arg0, %c0_i32 : i32, i32
  }
  func.func @transform_1(%arg0: i32, %arg1: i32) -> (i32, i32) {
    %c0_i32 = arith.constant 0 : i32
    %c0_i32_0 = arith.constant 0 : i32
    return %c0_i32, %arg1 : i32, i32
  }
  func.func @transform_2(%arg0: i32, %arg1: i32) -> (i32, i32) {
    %c0_i32 = arith.constant 0 : i32
    %c0_i32_0 = arith.constant 0 : i32
    return %c0_i32, %arg1 : i32, i32
  }
  func.func @transform_3(%arg0: i32, %arg1: i32) -> (i32, i32) {
    %c0_i32 = arith.constant 0 : i32
    return %arg0, %arg1 : i32, i32
  }
}

</mosaic_0001>

<bundles_post_ra>
// kernel: patch_embed_forward.1
= control target key start
LH: loop header
LB: loop body
LE: loop exit
PB: predicated region body
PF: predicated region fallthrough
CT: control target
= control target key end

     0   :  { %s433_s12 = smov 0   ;;  %s435_s13 = smov 0   ;;  %s487_s0 = inlined_call_operand.vmem [shape: f32[32,48], index: 0, kind: input, shape index: {}]   ;;  %s488_s1 = inlined_call_operand.vmem [shape: f32[48,128], index: 1, kind: input, shape index: {}]   ;;  %s489_s2 = inlined_call_operand.vmem [shape: f32[1,128], index: 2, kind: input, shape index: {}]   ;;  %s490_s3 = inlined_call_operand.vmem [shape: f32[32,128], index: 3, kind: output, shape index: {}]  }
   0x1   :  { %s437_s14 = smov 0  }
   0x2 LB: > { %s25_s15 = sadd.s32 1, %s407_s13  ;;  %p358_p0 = scmp.ge.s32.totalorder %s411_s14, 1  ;;  %s411_s14 = sphi %s437_s14, %s13_s14   ;;  %s407_s13 = sphi %s435_s13, %s492_s13   ;;  %s403_s12 = sphi %s433_s12, %s491_s12  }
   0x3   : > { %p27_p1 = scmp.ge.s32.totalorder %s25_s15, 4  ;;  %p167_p2 = scmp.lt.s32.totalorder %s411_s14, 5 }
   0x5   : > { %s494_s15 = smov (%p27_p1, %s25_s15), 0  ;;  %p168_p3 = pnand %p358_p0, %p167_p2 }
   0x6   : > { %p199_p4 = scmp.lt.s32.totalorder (!%p168_p3), %s403_s12, 3 }
   0x7   : > { %171 = sbr.rel (%p168_p3) target bundleno = 153 (0x99), region = 32 }
   0xc   : > { %v223_v0 = vld [vmem:[%s488_s1 + $0x28] sm:$0xff]  ;;  %v222_v1 = vld [vmem:[%s488_s1 + $0x20] sm:$0xff]  ;;  %v221_v2 = vld [vmem:[%s488_s1 + $0x18] sm:$0xff]  ;;  %s496_s12 = smov (!%p199_p4, %s403_s12), 3  ;;  %vm228_vm0 = vcmask 392192  }
   0xd   : > { %242 = vmatpush.msra.mxu0 %v223_v0  ;;  %v220_v3 = vld [vmem:[%s488_s1 + $0x10] sm:$0xff]  ;;  %s359_s24 = sshll.u32 %s496_s12, 3  ;;  %v219_v4 = vld [vmem:[%s488_s1 + $0x8] sm:$0xff]  ;;  %v218_v5 = vld [vmem:[%s488_s1] sm:$0xff] }
   0xe   : > { %s202_s29 = scalar_lea.vmem %s487_s0, %s359_s24  ;;  %v388_v7 = vld [vmem:[%s489_s2] ss:$0 sm:$0xff]  ;;  %s216_s9 = scalar_lea.vmem %s490_s3, %s359_s24 }
   0xf   : > { %243 = vmatpush.msra.mxu0 %v222_v1  ;;  %v217_v6 = vld [vmem:[%s202_s29] sm:$0xff] }
  0x11   : > { %244 = vmatpush.msra.mxu0 %v221_v2 }
  0x13   : > { %245 = vmatpush.msra.mxu0 %v220_v3 }
  0x15   : > { %246 = vmatpush.msra.mxu0 %v219_v4 }
  0x17   : > { %247 = vmatpush.msra.mxu0 %v218_v5 }
  0x18   : > { %361 = vmatmul.msk.f32.vlgmr.msra.gmra.mxu0 %vm228_vm0, %v217_v6 }
  0x95   : > { %v249_v8 = vpop.f32.mrf.mxu0 }
  0x96   : > { %v250_v9 = vadd.f32 %v388_v7, %v249_v8 }
  0x98   : > { %252 = vst [vmem:[%s216_s9] sm:$0xff] %v250_v9 }
  0x99 PF: > { %s13_s14 = sadd.s32 1, %s411_s14   ;;  %s491_s12 = smov %s407_s13 }
  0x9a   : > { %p10_p5 = scmp.ge.s32.totalorder %s13_s14, 6   ;;  %s492_s13 = smov %s494_s15 }
  0x9c   :  { %12 = sbr.rel (!%p10_p5) target bundleno = 2 (0x2), region = 68 }

</bundles_post_ra>
